<compile_context>
chip_gen: v7x
topology: tpu7x:2x2x1
jax: 0.10.0
libtpu: 0.0.40
codegen_flags: <defaults>
</compile_context>

<pallas_src>
import jax
import jax.numpy as jnp
from jax.experimental import pallas as pl
from jax.experimental.pallas import tpu as pltpu


_NEG = -1e30  # prior for padded (fake) classes; exp(_NEG - max) underflows to 0


def _round_up(x, m):
    return ((x + m - 1) // m) * m


def _naive_bayes_kernel(x_ref, w_ref, b_ref, out_ref):
    # x_ref:  (TB, Dp)  bf16 feature counts / values (zero-padded along D)
    # w_ref:  (Dp, Cp)  bf16 log P(feature | class)   (resident across the grid)
    # b_ref:  (1,  Cp)  f32  log P(class)  (padded classes = -1e30)
    # out_ref:(TB, Cp)  f32  normalized log-posterior over classes
    logits = (
        jnp.dot(x_ref[...], w_ref[...], preferred_element_type=jnp.float32)
        + b_ref[...]
    )
    # lean f32 log-softmax over the (lane-dense, 128-wide) class axis
    m = jnp.max(logits, axis=-1, keepdims=True)
    z = logits - m
    lse = jnp.log(jnp.sum(jnp.exp(z), axis=-1, keepdims=True))
    out_ref[...] = (z - lse).astype(out_ref.dtype)


def naive_bayes_forward(x, feature_log_prob, class_log_prior, *, block_b=512):
    """x: (B, D) f32; feature_log_prob: (D, C) f32; class_log_prior: (C,) f32."""
    B, D = x.shape
    C = feature_log_prob.shape[1]

    # --- pad to TPU-friendly shapes -------------------------------------
    C_pad = _round_up(C, 128)          # lane-dense output / full MXU N
    D_pad = _round_up(D, 256)          # full MXU K on v6e/v7x (also /128 for v5e)
    TB = min(block_b, _round_up(B, 8))  # batch tile (multiple of 8 sublanes)

    # Shrink the batch tile if the x double-buffer would blow the VMEM budget
    # (sized against v7x's smaller VMEM).
    while TB > 8 and 2 * TB * D_pad * 2 > (24 << 20):
        TB //= 2
    B_pad = _round_up(B, TB)

    x_p = jnp.pad(x.astype(jnp.bfloat16), ((0, B_pad - B), (0, D_pad - D)))
    w_p = jnp.pad(
        feature_log_prob.astype(jnp.bfloat16), ((0, D_pad - D), (0, C_pad - C))
    )
    b_p = jnp.pad(
        class_log_prior.astype(jnp.float32), (0, C_pad - C), constant_values=_NEG
    ).reshape(1, C_pad)

    # --- VMEM budget (double-buffered x/out, resident w/bias) -----------
    vmem_need = (
        2 * TB * D_pad * 2          # x  double buffer (bf16)
        + 2 * TB * C_pad * 4        # out double buffer (f32)
        + 2 * D_pad * C_pad * 2     # w  (bf16)
        + 2 * C_pad * 4             # bias (f32)
    )
    vmem_limit = min(max(vmem_need + (4 << 20), 32 << 20), 48 << 20)

    grid = (B_pad // TB,)

    out = pl.pallas_call(
        _naive_bayes_kernel,
        out_shape=jax.ShapeDtypeStruct((B_pad, C_pad), jnp.float32),
        grid_spec=pltpu.PrefetchScalarGridSpec(
            num_scalar_prefetch=0,
            grid=grid,
            in_specs=[
                pl.BlockSpec((TB, D_pad), lambda i: (i, 0)),      # x tile
                pl.BlockSpec((D_pad, C_pad), lambda i: (0, 0)),   # W resident
                pl.BlockSpec((1, C_pad), lambda i: (0, 0)),       # bias resident
            ],
            out_specs=pl.BlockSpec((TB, C_pad), lambda i: (i, 0)),
        ),
        compiler_params=pltpu.CompilerParams(
            dimension_semantics=("parallel",),
            vmem_limit_bytes=vmem_limit,
        ),
    )(x_p, w_p, b_p)

    # strip batch / class padding
    return out[:B, :C]


def _reference(x, feature_log_prob, class_log_prior):
    # Same numerics as the kernel: bf16 operands, f32 accumulation, f32 softmax.
    logits = (
        jnp.dot(
            x.astype(jnp.bfloat16),
            feature_log_prob.astype(jnp.bfloat16),
            preferred_element_type=jnp.float32,
        )
        + class_log_prior[None, :].astype(jnp.float32)
    )
    return jax.nn.log_softmax(logits, axis=-1)


if __name__ == "__main__":
    key = jax.random.PRNGKey(0)
    k_x, k_w = jax.random.split(key)

    batch = 8
    input_size = 64
    num_classes = 16

    # Deterministic synthetic parameters (no checkpoint load).
    raw = jax.random.normal(k_w, (input_size, num_classes), dtype=jnp.float32)
    feature_log_prob = jax.nn.log_softmax(raw, axis=0)   # log P(feature | class)
    class_log_prior = jnp.full((num_classes,), -jnp.log(num_classes), jnp.float32)

    # Non-negative "count"-like inputs, as in multinomial NB.
    x = jax.random.uniform(k_x, (batch, input_size), dtype=jnp.float32) * 5.0

    out = naive_bayes_forward(x, feature_log_prob, class_log_prior)
    out = jax.block_until_ready(out)

    ref = _reference(x, feature_log_prob, class_log_prior)
    assert out.shape == (batch, num_classes)
    assert bool(jnp.allclose(out, ref, atol=2e-3, rtol=2e-3)), (
        float(jnp.max(jnp.abs(out - ref)))
    )

    print("KERNEL_OK")
</pallas_src>

<mosaic_0001>
module attributes {stable_mosaic.version = 11 : i64} {
  func.func @_naive_bayes_kernel(%arg0: i32, %arg1: memref<8x256xbf16, #tpu.memory_space<vmem>>, %arg2: memref<256x128xbf16, #tpu.memory_space<vmem>>, %arg3: memref<1x128xf32, #tpu.memory_space<vmem>>, %arg4: memref<8x128xf32, #tpu.memory_space<vmem>>) attributes {dimension_semantics = [#tpu.dimension_semantics<parallel>], iteration_bounds = array<i64: 1>, scalar_prefetch = 0 : i64, scratch_operands = 0 : i64, tpu.core_type = #tpu.core_type<tc>, window_params = [{transform_indices = @transform_0, window_bounds = array<i64: 8, 256>}, {pipeline_mode = #tpu.pipeline_mode<synchronous>, transform_indices = @transform_1, window_bounds = array<i64: 256, 128>}, {pipeline_mode = #tpu.pipeline_mode<synchronous>, transform_indices = @transform_2, window_bounds = array<i64: 1, 128>}, {transform_indices = @transform_3, window_bounds = array<i64: 8, 128>}]} {
    %c0 = arith.constant 0 : index
    %c0_0 = arith.constant 0 : index
    %0 = vector.load %arg1[%c0, %c0_0] : memref<8x256xbf16, #tpu.memory_space<vmem>>, vector<8x256xbf16>
    %c0_1 = arith.constant 0 : index
    %c0_2 = arith.constant 0 : index
    %1 = vector.load %arg2[%c0_1, %c0_2] : memref<256x128xbf16, #tpu.memory_space<vmem>>, vector<256x128xbf16>
    %cst = arith.constant dense<0.000000e+00> : vector<8x128xf32>
    %2 = tpu.matmul %0, %1, %cst {dimension_numbers = #tpu.dot_dimension_numbers<[1], [0], [0], [1], [0, 0, 1, 1], [], []>} : vector<8x256xbf16>, vector<256x128xbf16>, vector<8x128xf32> -> vector<8x128xf32>
    %c0_3 = arith.constant 0 : index
    %c0_4 = arith.constant 0 : index
    %3 = vector.load %arg3[%c0_3, %c0_4] : memref<1x128xf32, #tpu.memory_space<vmem>>, vector<1x128xf32>
    %4 = vector.broadcast %3 : vector<1x128xf32> to vector<8x128xf32>
    %5 = arith.addf %2, %4 : vector<8x128xf32>
    %cst_5 = arith.constant dense<0xFF800000> : vector<8xf32>
    %6 = vector.multi_reduction <maximumf>, %5, %cst_5 [1] : vector<8x128xf32> to vector<8xf32>
    %7 = vector.shape_cast %6 : vector<8xf32> to vector<8x1xf32>
    %8 = vector.broadcast %7 : vector<8x1xf32> to vector<8x128xf32>
    %9 = arith.subf %5, %8 : vector<8x128xf32>
    %10 = math.exp %9 : vector<8x128xf32>
    %cst_6 = arith.constant dense<0.000000e+00> : vector<8xf32>
    %11 = vector.multi_reduction <add>, %10, %cst_6 [1] : vector<8x128xf32> to vector<8xf32>
    %12 = vector.shape_cast %11 : vector<8xf32> to vector<8x1xf32>
    %13 = math.log %12 : vector<8x1xf32>
    %14 = vector.broadcast %13 : vector<8x1xf32> to vector<8x128xf32>
    %15 = arith.subf %9, %14 : vector<8x128xf32>
    %c0_7 = arith.constant 0 : index
    %c0_8 = arith.constant 0 : index
    %16 = vector.load %arg4[%c0_7, %c0_8] : memref<8x128xf32, #tpu.memory_space<vmem>>, vector<8x128xf32>
    tpu.vector_store %arg4[%c0_7, %c0_8], %15 {strides = array<i32>} : memref<8x128xf32, #tpu.memory_space<vmem>>, vector<8x128xf32>,
    return
  }
  func.func @transform_0(%arg0: i32) -> (i32, i32) {
    %c0_i32 = arith.constant 0 : i32
    %c0_i32_0 = arith.constant 0 : i32
    return %arg0, %c0_i32 : i32, i32
  }
  func.func @transform_1(%arg0: i32) -> (i32, i32) {
    %c0_i32 = arith.constant 0 : i32
    %c0_i32_0 = arith.constant 0 : i32
    %c0_i32_1 = arith.constant 0 : i32
    return %c0_i32, %c0_i32_0 : i32, i32
  }
  func.func @transform_2(%arg0: i32) -> (i32, i32) {
    %c0_i32 = arith.constant 0 : i32
    %c0_i32_0 = arith.constant 0 : i32
    %c0_i32_1 = arith.constant 0 : i32
    return %c0_i32, %c0_i32_0 : i32, i32
  }
  func.func @transform_3(%arg0: i32) -> (i32, i32) {
    %c0_i32 = arith.constant 0 : i32
    %c0_i32_0 = arith.constant 0 : i32
    return %arg0, %c0_i32 : i32, i32
  }
}

</mosaic_0001>

<bundles_post_ra>
// kernel: tpu_custom_call.1
= control target key start
LH: loop header
LB: loop body
LE: loop exit
PB: predicated region body
PF: predicated region fallthrough
CT: control target
= control target key end

     0   :  { %8 = vsyncpa [#allocation3], 0  ;;  %s463_s0 = inlined_call_operand.hbm [shape: bf16[8,256], index: 0, kind: input, shape index: {}]   ;;  %s464_s1 = inlined_call_operand.hbm [shape: bf16[256,128], index: 1, kind: input, shape index: {}]   ;;  %s465_s2 = inlined_call_operand.vmem [shape: f32[1,128], index: 2, kind: input, shape index: {}]   ;;  %s466_s3 = inlined_call_operand.hbm [shape: f32[8,128], index: 3, kind: output, shape index: {}]  }
   0x1   :  { %9 = vsyncpa [#allocation6], 0 }
   0x2   :  { %10 = vsyncpa [#allocation4], 0  ;;  %s392_s12 = smov [#allocation2]   ;;  %s393_s14 = smov [#allocation5]  }
   0x3   :  { %s17_s13 = sshll.u32 %s392_s12, 4  ;;  %s26_s15 = sshll.u32 %s393_s14, 4  ;;  %s18_s13 = int_to_ptr.vmem [resolvable:$true] %s17_s13  ;;  %s417_s15 = int_to_ptr.vmem [resolvable:$true] %s26_s15 }
   0x4   :  { %s320_s18 = scalar_lea.hbm %s463_s0, 128 }
   0x5   :  { %p321_p0 = scmp.ne.s32.totalorder %s463_s0, %s320_s18  ;;  %p324_p1 = scmp.lt.u32.totalorder %s320_s18, %s463_s0 }
   0x7   :  { %p326_p2 = pnand %p324_p1, %p321_p0 }
   0x9   :  { %329 = shalt.err (!%p326_p2)
}
   0xa   :  { %s330_s23 = scalar_lea.vmem %s18_s13, 128  ;;  %p335_p4 = scmp.lt.s32.totalorder %s18_s13, %s18_s13 }
   0xb   :  { %p331_p3 = scmp.ne.s32.totalorder %s18_s13, %s330_s23  ;;  %p336_p5 = scmp.lt.s32.totalorder %s330_s23, %s330_s23 }
   0xd   :  { %p337_p6 = por %p336_p5, %p335_p4 }
   0xf   :  { %p338_p7 = pnand %p337_p6, %p331_p3 }
  0x11   :  { %341 = shalt.err (!%p338_p7)
}
  0x12   :  { %20 = dma.hbm_to_vmem [thread:$0]  %s463_s0, 128, %s18_s13, [#allocation3]  }
  0x13   :  { %s342_s28 = scalar_lea.hbm %s464_s1, 2048 }
  0x14   :  { %p343_p8 = scmp.ne.s32.totalorder %s464_s1, %s342_s28  ;;  %p346_p9 = scmp.lt.u32.totalorder %s342_s28, %s464_s1 }
  0x16   :  { %p348_p10 = pnand %p346_p9, %p343_p8 }
  0x18   :  { %351 = shalt.err (!%p348_p10)
}
  0x19   :  { %s352_s6 = scalar_lea.vmem %s417_s15, 2048  ;;  %p357_p12 = scmp.lt.s32.totalorder %s417_s15, %s417_s15 }
  0x1a   :  { %p353_p11 = scmp.ne.s32.totalorder %s417_s15, %s352_s6  ;;  %p358_p13 = scmp.lt.s32.totalorder %s352_s6, %s352_s6 }
  0x1c   :  { %p359_p0 = por %p358_p13, %p357_p12 }
  0x1e   :  { %p360_p1 = pnand %p359_p0, %p353_p11 }
  0x20   :  { %363 = shalt.err (!%p360_p1)
}
  0x21   :  { %s394_s0 = smov 64   ;;  %s395_s7 = smov 4  }
  0x22   :  { %32 = dma.hbm_to_vmem [thread:$0]  %s464_s1, 2048, %s417_s15, [#allocation6], %s394_s0, %s394_s0, %s395_s7  }
  0x23   :  { %386 = dma.done.wait [#allocation3], 128  }
  0x24   :  { %387 = vsyncadd [#allocation3], 4294967168 }
  0x25   :  { %388 = dma.done.wait [#allocation6], 2048  }
  0x26   :  { %389 = vsyncadd [#allocation6], 4294965248  ;;  %v298_v0 = vld [vmem:[#allocation5 + $0x40] sm:$0xff]   ;;  %v300_v2 = vld [vmem:[#allocation5 + $0x48] sm:$0xff]   ;;  %s396_s11 = smov [#allocation7]  }
  0x27   :  { %v299_v1 = vld [vmem:[#allocation5] sm:$0xff]   ;;  %271 = vmatprep.subr.bf16.mxu0 %v298_v0  ;;  %v301_v3 = vld [vmem:[#allocation5 + $0x8] sm:$0xff]   ;;  %v302_v4 = vld [vmem:[#allocation5 + $0x50] sm:$0xff]   ;;  %s242_s12 = sshll.u32 %s396_s11, 4  ;;  %s243_s12 = int_to_ptr.vmem [resolvable:$true] %s242_s12 }
  0x28   :  { %272 = vmatpush3.bf16.msra.mxu0 %v299_v1  ;;  %v303_v5 = vld [vmem:[#allocation5 + $0x10] sm:$0xff]   ;;  %v304_v6 = vld [vmem:[#allocation5 + $0x58] sm:$0xff]   ;;  %v306_v8 = vld [vmem:[#allocation5 + $0x60] sm:$0xff]   ;;  %p369_p3 = scmp.lt.s32.totalorder %s243_s12, %s243_s12 }
  0x29   :  { %273 = vmatprep.subr.bf16.mxu0 %v300_v2  ;;  %v305_v7 = vld [vmem:[#allocation5 + $0x18] sm:$0xff]   ;;  %v307_v9 = vld [vmem:[#allocation5 + $0x20] sm:$0xff]   ;;  %v308_v10 = vld [vmem:[#allocation5 + $0x68] sm:$0xff]  }
  0x2a   :  { %v42_v11 = vld [vmem:[#allocation2] sm:$0xff]  ;;  %v309_v13 = vld [vmem:[#allocation5 + $0x28] sm:$0xff]   ;;  %v310_v14 = vld [vmem:[#allocation5 + $0x70] sm:$0xff]  }
  0x2b   :  { %v254_v12 = vcombine.high %v42_v11, %v42_v11  ;;  %v311_v15 = vld [vmem:[#allocation5 + $0x30] sm:$0xff]   ;;  %v312_v16 = vld [vmem:[#allocation5 + $0x78] sm:$0xff]   ;;  %v253_v18 = vcombine.low %v42_v11, %v42_v11 }
  0x2c   :  { %274 = vmatpush3.bf16.msra.mxu0 %v301_v3  ;;  %v313_v17 = vld [vmem:[#allocation5 + $0x38] sm:$0xff]  }
  0x2d   :  { %275 = vmatprep.subr.bf16.mxu0 %v302_v4  ;;  %217 = vmatprep.mubr.bf16.mxu0 %v254_v12  ;;  %v252_v21 = vld [vmem:[%s465_s2] ss:$0 sm:$0xff]  ;;  %s364_s2 = scalar_lea.vmem %s243_s12, 128 }
  0x2e   :  { %p365_p2 = scmp.ne.s32.totalorder %s243_s12, %s364_s2  ;;  %p370_p4 = scmp.lt.s32.totalorder %s364_s2, %s364_s2 }
  0x30   :  { %276 = vmatpush3.bf16.msra.mxu0 %v303_v5  ;;  %p371_p5 = por %p370_p4, %p369_p3 }
  0x31   :  { %277 = vmatprep.subr.bf16.mxu0 %v304_v6 }
  0x32   :  { %p372_p6 = pnand %p371_p5, %p365_p2 }
  0x34   :  { %278 = vmatpush3.bf16.msra.mxu0 %v305_v7 }
  0x35   :  { %279 = vmatprep.subr.bf16.mxu0 %v306_v8 }
  0x38   :  { %280 = vmatpush3.bf16.msra.mxu0 %v307_v9 }
  0x39   :  { %281 = vmatprep.subr.bf16.mxu0 %v308_v10 }
  0x3c   :  { %282 = vmatpush3.bf16.msra.mxu0 %v309_v13 }
  0x3d   :  { %283 = vmatprep.subr.bf16.mxu0 %v310_v14 }
  0x40   :  { %284 = vmatpush3.bf16.msra.mxu0 %v311_v15 }
  0x41   :  { %285 = vmatprep.subr.bf16.mxu0 %v312_v16 }
  0x44   :  { %286 = vmatpush3.bf16.msra.mxu0 %v313_v17 }
  0x47   :  { %218 = vmatmul.mubr.bf16.vlgmr.msra.gmra.mrb[0].mxu0 %v253_v18 }
 0x11a   :  { %v287_v19 = vpop.f32.mrb[0].mxu0 }
 0x11b   :  { %v288_v20 = vpop.f32.mrb[1].mxu0 }
 0x11c   :  { %v289_v22 = vadd.f32 %v288_v20, %v287_v19  ;;  %v290_v23 = vpop.f32.mrb[2].mxu0 }
 0x11d   :  { %v291_v24 = vpop.f32.mrb[3].mxu0 }
 0x11e   :  { %v220_v25 = vadd.f32 %v289_v22, %v252_v21 }
 0x120   :  { %225 = vmax.xlane.f32.xlu0 %v220_v25 }
 0x1ad   :  { %v226_v26 = vpop.xlane.xlu0 %225 }
 0x1ae   :  { %v227_v27 = vsub.f32 %v220_v25, %v226_v26 }
 0x1b0   :  { %v228_v28 = vmul.f32 1.442695, %v227_v27 }
 0x1b2   :  { %316 = vpow2.f32 %v228_v28 }
 0x1bc   :  { %v317_v29 = vpop.eup %316 }
 0x1bd   :  { %230 = vadd.xlane.f32.xlu0 %v317_v29 }
 0x24a   :  { %v231_v30 = vpop.xlane.xlu0 %230 }
 0x24b   :  { %318 = vlog2.f32 %v231_v30 }
 0x255   :  { %v319_v31 = vpop.eup %318 }
 0x256   :  { %v233_v32 = vmul.f32 0.6931472, %v319_v31 }
 0x258   :  { %v234_v33 = vsub.f32 %v227_v27, %v233_v32 }
 0x25a   :  { %235 = vst [vmem:[#allocation7] sm:$0xff] %v234_v33 }
 0x25b   :  { %375 = shalt.err (!%p372_p6)
}
 0x25c   :  { %s376_s15 = scalar_lea.hbm %s466_s3, 128 }
 0x25d   :  { %p377_p7 = scmp.ne.s32.totalorder %s466_s3, %s376_s15  ;;  %p380_p8 = scmp.lt.u32.totalorder %s376_s15, %s466_s3 }
 0x25f   :  { %p382_p9 = pnand %p380_p8, %p377_p7 }
 0x261   :  { %385 = shalt.err (!%p382_p9)
}
 0x262   :  { %245 = dma.vmem_to_hbm [thread:$0]  %s243_s12, 128, %s466_s3, [#allocation4]  }
 0x263   :  { %390 = dma.done.wait [#allocation4], 128  }
 0x264   :  { %391 = vsyncadd [#allocation4], 4294967168 }
 0x265   :  { %249 = vsyncpa [#allocation3], 1 }
 0x266   :  { %250 = vsyncpa [#allocation6], 1 }
 0x267   :  { %251 = vsyncpa [#allocation4], 1 }

</bundles_post_ra>
